<compile_context>
chip_gen: v7x
topology: tpu7x:2x2x1
jax: 0.10.0
libtpu: 0.0.40
codegen_flags: <defaults>
</compile_context>

<pallas_src>
import jax
import jax.numpy as jnp
from jax import lax
from jax.experimental import pallas as pl
from jax.experimental.pallas import tpu as pltpu

LEAKY_SLOPE = 0.01
LN_EPS = 1e-5


# ----------------------------- fused kernel -------------------------------- #

def _make_fused_decoder_kernel(dims):
    """Build a kernel for the whole decoder.

    dims: tuple of (d_in, d_out) per Linear, hidden layers first, final last.
    Refs: x, w_buf (n_layers, max_in, max_out), v_buf (n_rows, max_width), o.
    """
    n_hidden = len(dims) - 1

    def kernel(x_ref, w_ref, v_ref, o_ref):
        # Everything stays in f32 vregs; no intermediate HBM traffic.
        h = x_ref[...].astype(jnp.float32)

        vrow = 0
        for l in range(n_hidden):
            d_in, d_out = dims[l]
            # Static slices recover the true (un-padded) parameter shapes.
            w = w_ref[l, :d_in, :d_out]                     # (d_in, d_out)
            b = v_ref[vrow + 0:vrow + 1, :d_out]            # (1, d_out)
            g = v_ref[vrow + 1:vrow + 2, :d_out]            # (1, d_out)
            beta = v_ref[vrow + 2:vrow + 3, :d_out]         # (1, d_out)
            vrow += 3

            # Linear + bias (MXU, f32 accumulation)
            h = jnp.dot(h, w, preferred_element_type=jnp.float32) + b
            # LeakyReLU: mul + max (2 VALU ops)
            h = jnp.maximum(h, LEAKY_SLOPE * h)

            # LayerNorm over the true feature width (h has no padded lanes):
            # one reduction pass, affine folded in.
            inv_d = jnp.float32(1.0 / d_out)
            mean = jnp.sum(h, axis=-1, keepdims=True) * inv_d          # (B,1)
            mean_sq = jnp.sum(h * h, axis=-1, keepdims=True) * inv_d   # (B,1)
            var = mean_sq - mean * mean
            inv_std = lax.rsqrt(var + LN_EPS)                          # EUP
            scale = g * inv_std                                        # (B,d)
            h = h * scale + (beta - mean * scale)
            # TODO(synk): Dropout is identity (eval mode); training-mode
            # dropout would need pltpu.prng_seed / pltpu.prng_random_bits.

        # Final Linear
        d_in, d_out = dims[-1]
        w = w_ref[n_hidden, :d_in, :d_out]
        b = v_ref[vrow:vrow + 1, :d_out]
        h = jnp.dot(h, w, preferred_element_type=jnp.float32) + b

        # Single cast + single store.
        o_ref[...] = h.astype(o_ref.dtype)

    return kernel


# ----------------------------- param packing -------------------------------- #

def pack_decoder_params(params):
    """Pack all layer parameters into two contiguous f32 buffers (do once).

    Returns (w_buf, v_buf, dims):
      w_buf: (n_layers, max_in, max_out)   zero-padded weight matrices
      v_buf: (3*n_hidden + 1, max_out)     rows = [b, gamma, beta]*hidden + b_out
      dims:  static tuple of (d_in, d_out) per Linear
    """
    dims = tuple((int(l["w"].shape[0]), int(l["w"].shape[1])) for l in params)
    n_hidden = len(params) - 1
    max_in = max(d for d, _ in dims)
    max_out = max(d for _, d in dims)

    w_buf = jnp.zeros((len(params), max_in, max_out), jnp.float32)
    for l, layer in enumerate(params):
        d_in, d_out = dims[l]
        w_buf = w_buf.at[l, :d_in, :d_out].set(layer["w"].astype(jnp.float32))

    v_buf = jnp.zeros((3 * n_hidden + 1, max_out), jnp.float32)
    r = 0
    for layer in params[:-1]:
        d_out = layer["w"].shape[1]
        v_buf = v_buf.at[r, :d_out].set(layer["b"].reshape(-1).astype(jnp.float32)); r += 1
        v_buf = v_buf.at[r, :d_out].set(layer["gamma"].reshape(-1).astype(jnp.float32)); r += 1
        v_buf = v_buf.at[r, :d_out].set(layer["beta"].reshape(-1).astype(jnp.float32)); r += 1
    v_buf = v_buf.at[r, :dims[-1][1]].set(
        params[-1]["b"].reshape(-1).astype(jnp.float32))
    return w_buf, v_buf, dims


# ----------------------------- forward wrapper ------------------------------ #

def decoder_forward(z, packed, *, batch_tile=None):
    """Fused decoder forward: one pallas_call for all layers.

    batch_tile=None (or >= B): single whole-batch block, no grid (toy scale).
    batch_tile=TB < B        : grid over batch tiles ("parallel" -> megacore).
    """
    w_buf, v_buf, dims = packed
    B, latent_dim = z.shape
    output_dim = dims[-1][1]
    kernel = _make_fused_decoder_kernel(dims)

    flops = sum(2 * B * d_in * d_out for d_in, d_out in dims)
    flops += sum(10 * B * d_out for _, d_out in dims[:-1])     # lrelu + LN + affine
    transcendentals = B * (len(dims) - 1)                      # one rsqrt/row/layer
    bytes_accessed = (z.size + w_buf.size + v_buf.size + B * output_dim) * 4
    cost = pl.CostEstimate(flops=int(flops),
                           transcendentals=int(transcendentals),
                           bytes_accessed=int(bytes_accessed))
    out_shape = jax.ShapeDtypeStruct((B, output_dim), z.dtype)

    if batch_tile is None or batch_tile >= B:
        # Toy-scale path: no grid (no per-step bookkeeping), 3 input DMAs total.
        vmem = pltpu.MemorySpace.VMEM
        return pl.pallas_call(
            kernel,
            out_shape=out_shape,
            in_specs=[pl.BlockSpec(memory_space=vmem)] * 3,
            out_specs=pl.BlockSpec(memory_space=vmem),
            cost_estimate=cost,
        )(z, w_buf, v_buf)

    # Production path: tile the batch axis. Weight/vector blocks use a constant
    # index_map so their DMA is not re-issued across grid steps; the x/out tile
    # DMAs are double-buffered behind compute by the Pallas pipeline.
    TB = int(batch_tile)
    grid = (pl.cdiv(B, TB),)
    in_specs = [
        pl.BlockSpec((TB, latent_dim), lambda i: (i, 0)),
        pl.BlockSpec(w_buf.shape, lambda i: (0, 0, 0)),
        pl.BlockSpec(v_buf.shape, lambda i: (0, 0)),
    ]
    out_specs = pl.BlockSpec((TB, output_dim), lambda i: (i, 0))
    return pl.pallas_call(
        kernel,
        out_shape=out_shape,
        grid=grid,
        in_specs=in_specs,
        out_specs=out_specs,
        compiler_params=pltpu.CompilerParams(
            dimension_semantics=("parallel",)),   # 2 TCs on v7x split the batch
        cost_estimate=cost,
    )(z, w_buf, v_buf)


# ----------------------------- params / reference --------------------------- #

def init_decoder_params(key, latent_dim, output_dim, decoder_layers):
    """Deterministic init mirroring PyTorch nn.Linear defaults
    (uniform(-1/sqrt(fan_in), 1/sqrt(fan_in))) and LayerNorm (gamma=1, beta=0)."""
    params = []
    prev_dim = latent_dim
    for units in decoder_layers:
        key, kw, kb = jax.random.split(key, 3)
        bound = 1.0 / jnp.sqrt(prev_dim)
        w = jax.random.uniform(kw, (prev_dim, units), jnp.float32, -bound, bound)
        b = jax.random.uniform(kb, (1, units), jnp.float32, -bound, bound)
        gamma = jnp.ones((1, units), jnp.float32)
        beta = jnp.zeros((1, units), jnp.float32)
        params.append(dict(w=w, b=b, gamma=gamma, beta=beta))
        prev_dim = units
    key, kw, kb = jax.random.split(key, 3)
    bound = 1.0 / jnp.sqrt(prev_dim)
    w = jax.random.uniform(kw, (prev_dim, output_dim), jnp.float32, -bound, bound)
    b = jax.random.uniform(kb, (1, output_dim), jnp.float32, -bound, bound)
    params.append(dict(w=w, b=b))
    return params


def decoder_forward_ref(z, params):
    """Pure-JAX reference for correctness checking."""
    x = z
    for layer in params[:-1]:
        h = x @ layer["w"] + layer["b"]
        h = jnp.where(h > 0, h, LEAKY_SLOPE * h)
        mean = jnp.mean(h, axis=-1, keepdims=True)
        var = jnp.mean((h - mean) ** 2, axis=-1, keepdims=True)
        h = (h - mean) * lax.rsqrt(var + LN_EPS)
        x = h * layer["gamma"] + layer["beta"]
    return x @ params[-1]["w"] + params[-1]["b"]


if __name__ == "__main__":
    key = jax.random.PRNGKey(0)
    key, kz, kp, kz2 = jax.random.split(key, 4)

    # Shapes consistent with the module:
    #   latent_dim=16, decoder_layers=[32, 64], output_dim=16, batch=8
    batch, latent_dim, output_dim = 8, 16, 16
    decoder_layers = [32, 64]

    params = init_decoder_params(kp, latent_dim, output_dim, decoder_layers)
    packed = pack_decoder_params(params)   # pack once, reuse across calls

    # --- toy-scale path: single fused block, no grid -------------------------
    z = jax.random.normal(kz, (batch, latent_dim), jnp.float32)
    out = jax.block_until_ready(decoder_forward(z, packed))
    ref = decoder_forward_ref(z, params)
    assert out.shape == (batch, output_dim)
    assert jnp.allclose(out, ref, atol=1e-4, rtol=1e-4), "mismatch (fused path)"

    # --- batch-tiled path (production structure): grid over 256-row tiles ----
    big_batch = 512
    z2 = jax.random.normal(kz2, (big_batch, latent_dim), jnp.float32)
    out2 = jax.block_until_ready(decoder_forward(z2, packed, batch_tile=256))
    ref2 = decoder_forward_ref(z2, params)
    assert out2.shape == (big_batch, output_dim)
    assert jnp.allclose(out2, ref2, atol=1e-4, rtol=1e-4), "mismatch (tiled path)"

    print("KERNEL_OK")
</pallas_src>

<mosaic_0001>
module attributes {stable_mosaic.version = 11 : i64} {
  func.func @kernel(%arg0: memref<8x16xf32, #tpu.memory_space<vmem>>, %arg1: memref<3x64x64xf32, #tpu.memory_space<vmem>>, %arg2: memref<7x64xf32, #tpu.memory_space<vmem>>, %arg3: memref<8x16xf32, #tpu.memory_space<vmem>>) attributes {dimension_semantics = [], scalar_prefetch = 0 : i64, scratch_operands = 0 : i64, tpu.core_type = #tpu.core_type<tc>} {
    %c0 = arith.constant 0 : index
    %c0_0 = arith.constant 0 : index
    %0 = vector.load %arg0[%c0, %c0_0] : memref<8x16xf32, #tpu.memory_space<vmem>>, vector<8x16xf32>
    %c0_1 = arith.constant 0 : index
    %c0_2 = arith.constant 0 : index
    %c0_3 = arith.constant 0 : index
    %1 = vector.load %arg1[%c0_1, %c0_2, %c0_3] : memref<3x64x64xf32, #tpu.memory_space<vmem>>, vector<1x16x32xf32>
    %2 = vector.shape_cast %1 : vector<1x16x32xf32> to vector<16x32xf32>
    %c0_4 = arith.constant 0 : index
    %c0_5 = arith.constant 0 : index
    %3 = vector.load %arg2[%c0_4, %c0_5] : memref<7x64xf32, #tpu.memory_space<vmem>>, vector<1x32xf32>
    %c1 = arith.constant 1 : index
    %c0_6 = arith.constant 0 : index
    %4 = vector.load %arg2[%c1, %c0_6] : memref<7x64xf32, #tpu.memory_space<vmem>>, vector<1x32xf32>
    %c2 = arith.constant 2 : index
    %c0_7 = arith.constant 0 : index
    %5 = vector.load %arg2[%c2, %c0_7] : memref<7x64xf32, #tpu.memory_space<vmem>>, vector<1x32xf32>
    %cst = arith.constant dense<0.000000e+00> : vector<8x32xf32>
    %6 = tpu.matmul %0, %2, %cst {dimension_numbers = #tpu.dot_dimension_numbers<[1], [0], [0], [1], [0, 0, 1, 1], [], []>} : vector<8x16xf32>, vector<16x32xf32>, vector<8x32xf32> -> vector<8x32xf32>
    %7 = vector.broadcast %3 : vector<1x32xf32> to vector<8x32xf32>
    %8 = arith.addf %6, %7 : vector<8x32xf32>
    %cst_8 = arith.constant 0.00999999977 : f32
    %9 = vector.broadcast %cst_8 : f32 to vector<8x32xf32>
    %10 = arith.mulf %9, %8 : vector<8x32xf32>
    %11 = arith.maximumf %8, %10 : vector<8x32xf32>
    %cst_9 = arith.constant dense<0.000000e+00> : vector<8xf32>
    %12 = vector.multi_reduction <add>, %11, %cst_9 [1] : vector<8x32xf32> to vector<8xf32>
    %13 = vector.shape_cast %12 : vector<8xf32> to vector<8x1xf32>
    %cst_10 = arith.constant 3.125000e-02 : f32
    %14 = vector.broadcast %cst_10 : f32 to vector<8x1xf32>
    %15 = arith.mulf %13, %14 : vector<8x1xf32>
    %16 = arith.mulf %11, %11 : vector<8x32xf32>
    %cst_11 = arith.constant dense<0.000000e+00> : vector<8xf32>
    %17 = vector.multi_reduction <add>, %16, %cst_11 [1] : vector<8x32xf32> to vector<8xf32>
    %18 = vector.shape_cast %17 : vector<8xf32> to vector<8x1xf32>
    %cst_12 = arith.constant 3.125000e-02 : f32
    %19 = vector.broadcast %cst_12 : f32 to vector<8x1xf32>
    %20 = arith.mulf %18, %19 : vector<8x1xf32>
    %21 = arith.mulf %15, %15 : vector<8x1xf32>
    %22 = arith.subf %20, %21 : vector<8x1xf32>
    %cst_13 = arith.constant 9.99999974E-6 : f32
    %23 = vector.broadcast %cst_13 : f32 to vector<8x1xf32>
    %24 = arith.addf %22, %23 : vector<8x1xf32>
    %25 = math.rsqrt %24 : vector<8x1xf32>
    %26 = vector.broadcast %4 : vector<1x32xf32> to vector<8x32xf32>
    %27 = vector.broadcast %25 : vector<8x1xf32> to vector<8x32xf32>
    %28 = arith.mulf %26, %27 : vector<8x32xf32>
    %29 = arith.mulf %11, %28 : vector<8x32xf32>
    %30 = vector.broadcast %15 : vector<8x1xf32> to vector<8x32xf32>
    %31 = arith.mulf %30, %28 : vector<8x32xf32>
    %32 = vector.broadcast %5 : vector<1x32xf32> to vector<8x32xf32>
    %33 = arith.subf %32, %31 : vector<8x32xf32>
    %34 = arith.addf %29, %33 : vector<8x32xf32>
    %c1_14 = arith.constant 1 : index
    %c0_15 = arith.constant 0 : index
    %c0_16 = arith.constant 0 : index
    %35 = vector.load %arg1[%c1_14, %c0_15, %c0_16] : memref<3x64x64xf32, #tpu.memory_space<vmem>>, vector<1x32x64xf32>
    %36 = vector.shape_cast %35 : vector<1x32x64xf32> to vector<32x64xf32>
    %c3 = arith.constant 3 : index
    %c0_17 = arith.constant 0 : index
    %37 = vector.load %arg2[%c3, %c0_17] : memref<7x64xf32, #tpu.memory_space<vmem>>, vector<1x64xf32>
    %c4 = arith.constant 4 : index
    %c0_18 = arith.constant 0 : index
    %38 = vector.load %arg2[%c4, %c0_18] : memref<7x64xf32, #tpu.memory_space<vmem>>, vector<1x64xf32>
    %c5 = arith.constant 5 : index
    %c0_19 = arith.constant 0 : index
    %39 = vector.load %arg2[%c5, %c0_19] : memref<7x64xf32, #tpu.memory_space<vmem>>, vector<1x64xf32>
    %cst_20 = arith.constant dense<0.000000e+00> : vector<8x64xf32>
    %40 = tpu.matmul %34, %36, %cst_20 {dimension_numbers = #tpu.dot_dimension_numbers<[1], [0], [0], [1], [0, 0, 1, 1], [], []>} : vector<8x32xf32>, vector<32x64xf32>, vector<8x64xf32> -> vector<8x64xf32>
    %41 = vector.broadcast %37 : vector<1x64xf32> to vector<8x64xf32>
    %42 = arith.addf %40, %41 : vector<8x64xf32>
    %cst_21 = arith.constant 0.00999999977 : f32
    %43 = vector.broadcast %cst_21 : f32 to vector<8x64xf32>
    %44 = arith.mulf %43, %42 : vector<8x64xf32>
    %45 = arith.maximumf %42, %44 : vector<8x64xf32>
    %cst_22 = arith.constant dense<0.000000e+00> : vector<8xf32>
    %46 = vector.multi_reduction <add>, %45, %cst_22 [1] : vector<8x64xf32> to vector<8xf32>
    %47 = vector.shape_cast %46 : vector<8xf32> to vector<8x1xf32>
    %cst_23 = arith.constant 1.562500e-02 : f32
    %48 = vector.broadcast %cst_23 : f32 to vector<8x1xf32>
    %49 = arith.mulf %47, %48 : vector<8x1xf32>
    %50 = arith.mulf %45, %45 : vector<8x64xf32>
    %cst_24 = arith.constant dense<0.000000e+00> : vector<8xf32>
    %51 = vector.multi_reduction <add>, %50, %cst_24 [1] : vector<8x64xf32> to vector<8xf32>
    %52 = vector.shape_cast %51 : vector<8xf32> to vector<8x1xf32>
    %cst_25 = arith.constant 1.562500e-02 : f32
    %53 = vector.broadcast %cst_25 : f32 to vector<8x1xf32>
    %54 = arith.mulf %52, %53 : vector<8x1xf32>
    %55 = arith.mulf %49, %49 : vector<8x1xf32>
    %56 = arith.subf %54, %55 : vector<8x1xf32>
    %cst_26 = arith.constant 9.99999974E-6 : f32
    %57 = vector.broadcast %cst_26 : f32 to vector<8x1xf32>
    %58 = arith.addf %56, %57 : vector<8x1xf32>
    %59 = math.rsqrt %58 : vector<8x1xf32>
    %60 = vector.broadcast %38 : vector<1x64xf32> to vector<8x64xf32>
    %61 = vector.broadcast %59 : vector<8x1xf32> to vector<8x64xf32>
    %62 = arith.mulf %60, %61 : vector<8x64xf32>
    %63 = arith.mulf %45, %62 : vector<8x64xf32>
    %64 = vector.broadcast %49 : vector<8x1xf32> to vector<8x64xf32>
    %65 = arith.mulf %64, %62 : vector<8x64xf32>
    %66 = vector.broadcast %39 : vector<1x64xf32> to vector<8x64xf32>
    %67 = arith.subf %66, %65 : vector<8x64xf32>
    %68 = arith.addf %63, %67 : vector<8x64xf32>
    %c2_27 = arith.constant 2 : index
    %c0_28 = arith.constant 0 : index
    %c0_29 = arith.constant 0 : index
    %69 = vector.load %arg1[%c2_27, %c0_28, %c0_29] : memref<3x64x64xf32, #tpu.memory_space<vmem>>, vector<1x64x16xf32>
    %70 = vector.shape_cast %69 : vector<1x64x16xf32> to vector<64x16xf32>
    %c6 = arith.constant 6 : index
    %c0_30 = arith.constant 0 : index
    %71 = vector.load %arg2[%c6, %c0_30] : memref<7x64xf32, #tpu.memory_space<vmem>>, vector<1x16xf32>
    %cst_31 = arith.constant dense<0.000000e+00> : vector<8x16xf32>
    %72 = tpu.matmul %68, %70, %cst_31 {dimension_numbers = #tpu.dot_dimension_numbers<[1], [0], [0], [1], [0, 0, 1, 1], [], []>} : vector<8x64xf32>, vector<64x16xf32>, vector<8x16xf32> -> vector<8x16xf32>
    %73 = vector.broadcast %71 : vector<1x16xf32> to vector<8x16xf32>
    %74 = arith.addf %72, %73 : vector<8x16xf32>
    %c0_32 = arith.constant 0 : index
    %c0_33 = arith.constant 0 : index
    %75 = vector.load %arg3[%c0_32, %c0_33] : memref<8x16xf32, #tpu.memory_space<vmem>>, vector<8x16xf32>
    tpu.vector_store %arg3[%c0_32, %c0_33], %74 {strides = array<i32>} : memref<8x16xf32, #tpu.memory_space<vmem>>, vector<8x16xf32>,
    return
  }
}

</mosaic_0001>

<bundles_post_ra>
// kernel: tpu_custom_call.1
= control target key start
LH: loop header
LB: loop body
LE: loop exit
PB: predicated region body
PF: predicated region fallthrough
CT: control target
= control target key end

     0   :  { %8 = vsyncpa [#allocation3], 0  ;;  %s667_s0 = inlined_call_operand.hbm [shape: f32[8,16], index: 0, kind: input, shape index: {}]   ;;  %s668_s1 = inlined_call_operand.hbm [shape: f32[3,64,64], index: 1, kind: input, shape index: {}]   ;;  %s669_s2 = inlined_call_operand.hbm [shape: f32[7,64], index: 2, kind: input, shape index: {}]   ;;  %s670_s3 = inlined_call_operand.hbm [shape: f32[8,16], index: 3, kind: output, shape index: {}]  }
   0x1   :  { %9 = vsyncpa [#allocation6], 0 }
   0x2   :  { %10 = vsyncpa [#allocation4], 0  ;;  %s575_s12 = smov [#allocation5]   ;;  %s481_s16 = scalar_lea.hbm %s668_s1, 3072 }
   0x3   :  { %s26_s13 = sshll.u32 %s575_s12, 4  ;;  %p482_p0 = scmp.ne.s32.totalorder %s668_s1, %s481_s16  ;;  %s27_s13 = int_to_ptr.vmem [resolvable:$true] %s26_s13 }
   0x4   :  { %p485_p1 = scmp.lt.u32.totalorder %s481_s16, %s668_s1 }
   0x6   :  { %p487_p2 = pnand %p485_p1, %p482_p0 }
   0x8   :  { %490 = shalt.err (!%p487_p2)
}
   0x9   :  { %s491_s21 = scalar_lea.vmem %s27_s13, 3072  ;;  %p496_p4 = scmp.lt.s32.totalorder %s27_s13, %s27_s13 }
   0xa   :  { %p492_p3 = scmp.ne.s32.totalorder %s27_s13, %s491_s21  ;;  %p497_p5 = scmp.lt.s32.totalorder %s491_s21, %s491_s21 }
   0xc   :  { %p498_p6 = por %p497_p5, %p496_p4 }
   0xe   :  { %p499_p7 = pnand %p498_p6, %p492_p3 }
  0x10   :  { %502 = shalt.err (!%p499_p7)
}
  0x11   :  { %s576_s22 = smov 128   ;;  %s577_s23 = smov 8  }
  0x12   :  { %32 = dma.hbm_to_vmem [thread:$0]  %s668_s1, 3072, %s27_s13, [#allocation6], %s576_s22, %s576_s22, %s577_s23  }
  0x13   :  { %s578_s26 = smov [#allocation2]   ;;  %s579_s28 = smov [#allocation7]  }
  0x14   :  { %s17_s27 = sshll.u32 %s578_s26, 4  ;;  %s39_s29 = sshll.u32 %s579_s28, 4  ;;  %s18_s27 = int_to_ptr.vmem [resolvable:$true] %s17_s27  ;;  %s40_s29 = int_to_ptr.vmem [resolvable:$true] %s39_s29 }
  0x15   :  { %s503_s5 = scalar_lea.hbm %s667_s0, 128 }
  0x16   :  { %p504_p8 = scmp.ne.s32.totalorder %s667_s0, %s503_s5  ;;  %p507_p9 = scmp.lt.u32.totalorder %s503_s5, %s667_s0 }
  0x18   :  { %p509_p10 = pnand %p507_p9, %p504_p8 }
  0x1a   :  { %512 = shalt.err (!%p509_p10)
}
  0x1b   :  { %s513_s1 = scalar_lea.vmem %s18_s27, 128  ;;  %p518_p12 = scmp.lt.s32.totalorder %s18_s27, %s18_s27 }
  0x1c   :  { %p514_p11 = scmp.ne.s32.totalorder %s18_s27, %s513_s1  ;;  %p519_p13 = scmp.lt.s32.totalorder %s513_s1, %s513_s1 }
  0x1e   :  { %p520_p0 = por %p519_p13, %p518_p12 }
  0x20   :  { %p521_p1 = pnand %p520_p0, %p514_p11 }
  0x22   :  { %524 = shalt.err (!%p521_p1)
}
  0x23   :  { %20 = dma.hbm_to_vmem [thread:$0]  %s667_s0, 128, %s18_s27, [#allocation3]  }
  0x24   :  { %s525_s14 = scalar_lea.hbm %s669_s2, 128 }
  0x25   :  { %p526_p2 = scmp.ne.s32.totalorder %s669_s2, %s525_s14  ;;  %p529_p3 = scmp.lt.u32.totalorder %s525_s14, %s669_s2 }
  0x27   :  { %p531_p4 = pnand %p529_p3, %p526_p2 }
  0x29   :  { %534 = shalt.err (!%p531_p4)
}
  0x2a   :  { %s535_s19 = scalar_lea.vmem %s40_s29, 128  ;;  %p540_p6 = scmp.lt.s32.totalorder %s40_s29, %s40_s29 }
  0x2b   :  { %p536_p5 = scmp.ne.s32.totalorder %s40_s29, %s535_s19  ;;  %p541_p7 = scmp.lt.s32.totalorder %s535_s19, %s535_s19 }
  0x2d   :  { %p542_p8 = por %p541_p7, %p540_p6 }
  0x2f   :  { %p543_p9 = pnand %p542_p8, %p536_p5 }
  0x31   :  { %546 = shalt.err (!%p543_p9)
}
  0x32   :  { %42 = dma.hbm_to_vmem [thread:$0]  %s669_s2, 128, %s40_s29, [#allocation6]  }
  0x33   :  { %569 = dma.done.wait [#allocation3], 128  }
  0x34   :  { %570 = vsyncadd [#allocation3], 4294967168 }
  0x35   :  { %571 = dma.done.wait [#allocation6], 3200  }
  0x36   :  { %572 = vsyncadd [#allocation6], 4294964096  ;;  %v580_v0 = vmov 0.0|0.0   ;;  %vm581_vm0 = vmmov 0   ;;  %v582_v1 = vmov 0.0   ;;  %v53_v2 = vld [vmem:[#allocation5] sm:$0xff] }
  0x37   :  { %447 = vmatprep.subr.bf16.mxu1 %v580_v0  ;;  %414 = vmatprep.mubr.msk.f32.mxu1 %vm581_vm0, %v582_v1  ;;  %v54_v3 = vld [vmem:[#allocation5 + $0x8] sm:$0xff]  ;;  %v52_v5 = vld [vmem:[#allocation2] sm:$0xff]  ;;  %vm62_vm1 = vcmask 130048   ;;  %v383_v6 = vld [vmem:[#allocation7] ss:$0 sm:$0xff]  ;;  %vm138_vm2 = vcmask 261120  }
  0x38   :  { %456 = vmatprep.subr.bf16.mxu0 %v580_v0  ;;  %444 = vmatprep.mubr.msk.f32.mxu0 %vm581_vm0, %v582_v1  ;;  %v448_v4 = vpack.c.bf16 %v54_v3, %v53_v2  ;;  %v166_v15 = vld [vmem:[#allocation5 + $0x40] sm:$0xff]  ;;  %v167_v16 = vld [vmem:[#allocation5 + $0x48] sm:$0xff]  ;;  %v168_v18 = vld [vmem:[#allocation5 + $0x50] sm:$0xff]  ;;  %vm252_vm3 = vcmask 523264   ;;  %s583_s2 = smov [#allocation8]  }
  0x39   :  { %v451_v17 = vpack.c.bf16 %v167_v16, %v166_v15  ;;  %v169_v19 = vld [vmem:[#allocation5 + $0x58] sm:$0xff]  ;;  %v385_v28 = vld [vmem:[#allocation7 + $0x1] ss:$0 sm:$0xff]  ;;  %v386_v31 = vld [vmem:[#allocation7 + $0x2] ss:$0 sm:$0xff]  ;;  %s373_s21 = sshll.u32 %s583_s2, 4  ;;  %s374_s21 = int_to_ptr.vmem [resolvable:$true] %s373_s21 }
  0x3a   :  { %449 = vmatpush3.bf16.msra.mxu1 %v448_v4  ;;  %v454_v20 = vpack.c.bf16 %v169_v19, %v168_v18  ;;  %v387_v36 = vld [vmem:[#allocation7 + $0x3] ss:$0 sm:$0xff]  ;;  %v281_v46 = vld [vmem:[#allocation5 + $0x88] sm:$0xff]  ;;  %v282_v47 = vld [vmem:[#allocation5 + $0x90] sm:$0xff]  ;;  %s547_s22 = scalar_lea.vmem %s374_s21, 128  ;;  %p552_p11 = scmp.lt.s32.totalorder %s374_s21, %s374_s21 }
  0x3b   :  { %450 = vmatprep.subr.bf16.mxu1 %v580_v0  ;;  %v280_v45 = vld [vmem:[#allocation5 + $0x80] sm:$0xff]  ;;  %v283_v49 = vld [vmem:[#allocation5 + $0x98] sm:$0xff]  ;;  %v285_v52 = vld [vmem:[#allocation5 + $0xa8] sm:$0xff]  ;;  %p548_p10 = scmp.ne.s32.totalorder %s374_s21, %s547_s22  ;;  %p553_p12 = scmp.lt.s32.totalorder %s547_s22, %s547_s22 }
  0x3c   :  { %v457_v48 = vpack.c.bf16 %v281_v46, %v280_v45  ;;  %v460_v50 = vpack.c.bf16 %v283_v49, %v282_v47  ;;  %v284_v51 = vld [vmem:[#allocation5 + $0xa0] sm:$0xff]  ;;  %v286_v54 = vld [vmem:[#allocation5 + $0xb0] sm:$0xff]  ;;  %v287_v55 = vld [vmem:[#allocation5 + $0xb8] sm:$0xff] }
  0x3d   :  { %415 = vmatmul.mubr.msk.f32.vlgmr.msra.gmra.mrb[0].mxu1 %vm62_vm1, %v52_v5  ;;  %v463_v53 = vpack.c.bf16 %v285_v52, %v284_v51  ;;  %v466_v56 = vpack.c.bf16 %v287_v55, %v286_v54  ;;  %v390_v4 = vld [vmem:[#allocation7 + $0x5] ss:$0 sm:$0xff]  ;;  %p554_p13 = por %p553_p12, %p552_p11 }
  0x3e   :  { %425 = vmatprep.mubr.msk.f32.mxu1 %vm581_vm0, %v582_v1  ;;  %452 = vmatpush3.bf16.msra.mxu1 %v451_v17  ;;  %v389_v1 = vld [vmem:[#allocation7 + $0x4] ss:$0 sm:$0xff] }
  0x3f   :  { %453 = vmatprep.subr.bf16.mxu1 %v580_v0  ;;  %458 = vmatpush3.bf16.msra.mxu0 %v457_v48  ;;  %p555_p0 = pnand %p554_p13, %p548_p10 }
  0x40   :  { %459 = vmatprep.subr.bf16.mxu0 %v580_v0 }
  0x42   :  { %455 = vmatpush3.bf16.msra.mxu1 %v454_v20 }
  0x43   :  { %461 = vmatpush3.bf16.msra.mxu0 %v460_v50 }
  0x44   :  { %462 = vmatprep.subr.bf16.mxu0 %v580_v0 }
  0x47   :  { %464 = vmatpush3.bf16.msra.mxu0 %v463_v53 }
  0x48   :  { %465 = vmatprep.subr.bf16.mxu0 %v580_v0  ;;  %v391_v0 = vld [vmem:[#allocation7 + $0x6] ss:$0 sm:$0xff] }
  0x4b   :  { %467 = vmatpush3.bf16.msra.mxu0 %v466_v56 }
 0x110   :  { %v132_v7 = vpop.f32.mrb[0].mxu1 }
 0x111   :  { %v133_v8 = vadd.f32 %v383_v6, %v132_v7  ;;  %v416_v9 = vpop.f32.mrb[1].mxu1 }
 0x113   :  { %v136_v10 = vmul.f32 0.01, %v133_v8 }
 0x115   :  { %v137_v11 = vmax.f32 %v133_v8, %v136_v10 }
 0x117   :  { %v139_v12 = vsel %vm138_vm2, %v137_v11, 0.0  ;;  %v143_v13 = vmul.f32 %v137_v11, %v137_v11 }
 0x118   :  { %140 = vadd.xlane.f32.xlu0 %v139_v12 }
 0x119   :  { %v144_v14 = vsel %vm138_vm2, %v143_v13, 0.0 }
 0x11c   :  { %145 = vadd.xlane.f32.xlu0 %v144_v14 }
 0x1a5   :  { %v141_v21 = vpop.xlane.xlu0 %140 }
 0x1a6   :  { %v142_v22 = vmul.f32 0.03125, %v141_v21 }
 0x1a8   :  { %v148_v24 = vmul.f32 %v142_v22, %v142_v22 }
 0x1a9   :  { %v146_v23 = vpop.xlane.xlu0 %145 }
 0x1aa   :  { %v147_v25 = vmul.f32 0.03125, %v146_v23 }
 0x1ac   :  { %v149_v26 = vsub.f32 %v147_v25, %v148_v24 }
 0x1ae   :  { %v150_v27 = vadd.f32 1e-05, %v149_v26 }
 0x1b0   :  { %477 = vrsqrt.f32 %v150_v27 }
 0x1ba   :  { %v478_v29 = vpop.eup %477 }
 0x1bb   :  { %v156_v30 = vmul.f32 %v478_v29, %v385_v28 }
 0x1bd   :  { %v158_v32 = vmul.f32 %v156_v30, %v142_v22  ;;  %v157_v33 = vmul.f32 %v156_v30, %v137_v11 }
 0x1bf   :  { %v163_v34 = vsub.f32 %v386_v31, %v158_v32 }
 0x1c1   :  { %v164_v35 = vadd.f32 %v163_v34, %v157_v33 }
 0x1c3   :  { %426 = vmatmul.mubr.msk.f32.vlgmr.msra.gmra.mrb[2].mxu1 %vm138_vm2, %v164_v35 }
 0x296   :  { %v246_v37 = vpop.f32.mrb[2].mxu1 }
 0x297   :  { %v247_v38 = vadd.f32 %v387_v36, %v246_v37  ;;  %v427_v39 = vpop.f32.mrb[3].mxu1 }
 0x299   :  { %v250_v40 = vmul.f32 0.01, %v247_v38 }
 0x29b   :  { %v251_v41 = vmax.f32 %v247_v38, %v250_v40 }
 0x29d   :  { %v253_v42 = vsel %vm252_vm3, %v251_v41, 0.0  ;;  %v257_v43 = vmul.f32 %v251_v41, %v251_v41 }
 0x29e   :  { %254 = vadd.xlane.f32.xlu1 %v253_v42 }
 0x29f   :  { %v258_v44 = vsel %vm252_vm3, %v257_v43, 0.0 }
 0x2a2   :  { %259 = vadd.xlane.f32.xlu1 %v258_v44 }
 0x32b   :  { %v255_v57 = vpop.xlane.xlu1 %254 }
 0x32c   :  { %v256_v58 = vmul.f32 0.015625, %v255_v57 }
 0x32e   :  { %v262_v60 = vmul.f32 %v256_v58, %v256_v58 }
 0x32f   :  { %v260_v59 = vpop.xlane.xlu1 %259 }
 0x330   :  { %v261_v61 = vmul.f32 0.015625, %v260_v59 }
 0x332   :  { %v263_v62 = vsub.f32 %v261_v61, %v262_v60 }
 0x334   :  { %v264_v63 = vadd.f32 1e-05, %v263_v62 }
 0x336   :  { %479 = vrsqrt.f32 %v264_v63 }
 0x340   :  { %v480_v2 = vpop.eup %479 }
 0x341   :  { %v270_v3 = vmul.f32 %v480_v2, %v389_v1 }
 0x343   :  { %v272_v5 = vmul.f32 %v270_v3, %v256_v58  ;;  %v271_v6 = vmul.f32 %v270_v3, %v251_v41 }
 0x345   :  { %v277_v7 = vsub.f32 %v390_v4, %v272_v5 }
 0x347   :  { %v278_v8 = vadd.f32 %v277_v7, %v271_v6 }
 0x349   :  { %445 = vmatmul.mubr.msk.f32.vlgmr.msra.gmra.mrb[0].mxu0 %vm252_vm3, %v278_v8 }
 0x41c   :  { %v362_v9 = vpop.f32.mrb[0].mxu0 }
 0x41d   :  { %v363_v10 = vadd.f32 %v391_v0, %v362_v9  ;;  %v446_v11 = vpop.f32.mrb[1].mxu0 }
 0x41f   :  { %366 = vst.msk [vmem:[#allocation8] sm:$0xff] %vm62_vm1, %v363_v10 }
 0x420   :  { %558 = shalt.err (!%p555_p0)
}
 0x421   :  { %s559_s25 = scalar_lea.hbm %s670_s3, 128 }
 0x422   :  { %p560_p1 = scmp.ne.s32.totalorder %s670_s3, %s559_s25  ;;  %p563_p2 = scmp.lt.u32.totalorder %s559_s25, %s670_s3 }
 0x424   :  { %p565_p3 = pnand %p563_p2, %p560_p1 }
 0x426   :  { %568 = shalt.err (!%p565_p3)
}
 0x427   :  { %376 = dma.vmem_to_hbm [thread:$0]  %s374_s21, 128, %s670_s3, [#allocation4]  }
 0x428   :  { %573 = dma.done.wait [#allocation4], 128  }
 0x429   :  { %574 = vsyncadd [#allocation4], 4294967168 }
 0x42a   :  { %380 = vsyncpa [#allocation3], 1 }
 0x42b   :  { %381 = vsyncpa [#allocation6], 1 }
 0x42c   :  { %382 = vsyncpa [#allocation4], 1 }

</bundles_post_ra>
